<compile_context>
chip_gen: v5e
topology: v5e:2x2
jax: 0.10.0
libtpu: 0.0.40
codegen_flags: <defaults>
</compile_context>

<pallas_src>
import functools

import jax
import jax.numpy as jnp
from jax.experimental import pallas as pl
from jax.experimental.pallas import tpu as pltpu

_LANE = 128
_SUBLANE = 8


def _mse_sum_kernel(x_ref, y_ref, o_ref, *, rows_valid, eff_rows, chunk_rows,
                    needs_mask):
    """Accumulate sum((x - y)^2) partials into a lane-shaped (8,128) output.

    x_ref, y_ref : (eff_rows, 128) tiles in the inputs' native dtype.
    o_ref        : (8, 128) f32 partial sums, resident across grid axis 1
                   (the reduction axis); one block per "split" (grid axis 0).
    """
    i = pl.program_id(1)

    @pl.when(i == 0)
    def _():
        o_ref[...] = jnp.zeros_like(o_ref)

    if eff_rows % _SUBLANE != 0:
        # Tiny-input fallback: eff_rows == full row count (< one sublane
        # group multiple); single full-extent block, never masked.
        d = x_ref[...].astype(jnp.float32) - y_ref[...].astype(jnp.float32)
        o_ref[0:1, :] += jnp.sum(d * d, axis=0, keepdims=True)
        return

    n_chunks = eff_rows // chunk_rows

    def _partial(masked):
        def chunk_sum(c, acc):
            r0 = pl.multiple_of(c * chunk_rows, chunk_rows)
            xb = x_ref[pl.ds(r0, chunk_rows), :].astype(jnp.float32)
            yb = y_ref[pl.ds(r0, chunk_rows), :].astype(jnp.float32)
            d = xb - yb
            dd = d * d
            if masked:
                # Rows past rows_valid in the ragged last block hold undefined
                # data; exclude them via select (handles NaN garbage too).
                row_ids = (jax.lax.broadcasted_iota(jnp.int32, dd.shape, 0)
                           + i * eff_rows + r0)
                dd = jnp.where(row_ids < rows_valid, dd, 0.0)
            # (chunk,128) -> (chunk/8, 8, 128); sum over axis 0 is pure
            # vreg-wise VPU adds (no XLU).
            return acc + jnp.sum(dd.reshape(-1, _SUBLANE, _LANE), axis=0)

        acc0 = jnp.zeros((_SUBLANE, _LANE), jnp.float32)
        if n_chunks == 1:
            return chunk_sum(jnp.int32(0), acc0)
        return jax.lax.fori_loop(0, n_chunks, chunk_sum, acc0, unroll=True)

    if not needs_mask:
        o_ref[...] += _partial(False)
    else:
        last = pl.num_programs(1) - 1

        @pl.when(i != last)
        def _():
            o_ref[...] += _partial(False)

        @pl.when(i == last)
        def _():
            o_ref[...] += _partial(True)


def mse_pn_one(inp, tgt, *, block_bytes=8 << 20, chunk_rows=1024):
    """MSE((inp+1)/2, (tgt+1)/2), mean over all elements. Returns f32 scalar."""
    assert inp.shape == tgt.shape, "input/target must have identical shapes"
    n = 1
    for s in inp.shape:
        n *= s
    if n == 0:
        return jnp.float32(jnp.nan)  # matches PyTorch mean-over-empty behavior

    # Keep native dtype: cast to f32 happens inside the kernel (after DMA).
    x = inp.reshape(-1)
    y = tgt.reshape(-1)

    # Lane-aligned prefix goes through the kernel; the <=127-element tail is
    # reduced in plain JAX (no padded HBM copies of the inputs).
    rows = n // _LANE
    n_main = rows * _LANE
    total = jnp.float32(0.0)
    if n_main < n:
        xt = x[n_main:].astype(jnp.float32)
        yt = y[n_main:].astype(jnp.float32)
        dt = xt - yt
        total = total + jnp.sum(dt * dt)

    if rows > 0:
        xm = x[:n_main]  # free slices of the contiguous flat views
        ym = y[:n_main]

        # Bytes-based tile size: ~block_bytes per input buffer, rounded down
        # to a multiple of chunk_rows (itself a multiple of 8).
        itemsize = max(x.dtype.itemsize, y.dtype.itemsize)
        block_rows = max(block_bytes // (_LANE * itemsize), chunk_rows)
        block_rows = (block_rows // chunk_rows) * chunk_rows

        # Split rows across TensorCores (v7x) only when it does not shrink
        # the per-core tile; 1-TC v5e/v6e and medium inputs skip the split.
        n_split = 2 if (rows % 2 == 0 and rows // 2 >= block_rows) else 1
        rows_half = rows // n_split

        eff_rows = min(block_rows, rows_half)   # multiple of chunk, or full dim
        steps = pl.cdiv(rows_half, eff_rows)
        needs_mask = (rows_half % eff_rows) != 0
        c_rows = chunk_rows if eff_rows % chunk_rows == 0 else eff_rows

        x3 = xm.reshape(n_split, rows_half, _LANE)   # free reshapes
        y3 = ym.reshape(n_split, rows_half, _LANE)

        # VMEM budget: 2 inputs x 2 pipeline buffers x tile, plus chunked
        # reduce intermediates + headroom; capped for v7x's 64 MiB VMEM.
        tile_bytes = eff_rows * _LANE * (x.dtype.itemsize + y.dtype.itemsize)
        vmem_limit = int(min(max(2 * tile_bytes + (12 << 20), 16 << 20),
                             48 << 20))

        kernel = functools.partial(
            _mse_sum_kernel,
            rows_valid=rows_half,
            eff_rows=eff_rows,
            chunk_rows=c_rows,
            needs_mask=needs_mask,
        )

        partials = pl.pallas_call(
            kernel,
            out_shape=jax.ShapeDtypeStruct((n_split, _SUBLANE, _LANE),
                                           jnp.float32),
            grid_spec=pltpu.PrefetchScalarGridSpec(
                num_scalar_prefetch=0,
                grid=(n_split, steps),
                in_specs=[
                    pl.BlockSpec((None, eff_rows, _LANE), lambda c, i: (c, i, 0)),
                    pl.BlockSpec((None, eff_rows, _LANE), lambda c, i: (c, i, 0)),
                ],
                out_specs=pl.BlockSpec((None, _SUBLANE, _LANE),
                                       lambda c, i: (c, 0, 0)),
            ),
            compiler_params=pltpu.CompilerParams(
                dimension_semantics=("parallel", "arbitrary"),
                vmem_limit_bytes=vmem_limit,
            ),
        )(x3, y3)
        total = total + jnp.sum(partials)

    # ((x+1)/2 - (y+1)/2)^2 == (x-y)^2 / 4  ->  fold the 1/4 into the mean.
    return total / (4.0 * n)


if __name__ == "__main__":
    key = jax.random.PRNGKey(0)
    k1, k2 = jax.random.split(key)

    # Small NCHW-shaped example inputs (module is shape-agnostic).
    shape = (2, 4, 16, 16)
    inp = jax.random.normal(k1, shape, dtype=jnp.float32)
    tgt = jax.random.normal(k2, shape, dtype=jnp.float32)

    loss = jax.block_until_ready(mse_pn_one(inp, tgt))

    # Reference check in plain JAX (same math as the PyTorch module).
    ref = jnp.mean(((inp + 1.0) / 2.0 - (tgt + 1.0) / 2.0) ** 2)
    assert jnp.allclose(loss, ref, rtol=1e-5, atol=1e-6), (loss, ref)

    # Extra sanity: ragged element count (exercises plain-JAX tail path and
    # the non-sublane-multiple full-extent block fallback).
    shape2 = (3, 5, 7, 11)   # 1155 elems -> 9 lane rows + 3-element tail
    a = jax.random.normal(k1, shape2, dtype=jnp.float32)
    b = jax.random.normal(k2, shape2, dtype=jnp.float32)
    loss2 = jax.block_until_ready(mse_pn_one(a, b))
    ref2 = jnp.mean(((a + 1.0) / 2.0 - (b + 1.0) / 2.0) ** 2)
    assert jnp.allclose(loss2, ref2, rtol=1e-5, atol=1e-6), (loss2, ref2)

    print("KERNEL_OK")
</pallas_src>

<mosaic_0001>
module attributes {stable_mosaic.version = 11 : i64} {
  func.func @_mse_sum_kernel(%arg0: i32, %arg1: i32, %arg2: memref<1x16x128xf32, #tpu.memory_space<vmem>>, %arg3: memref<1x16x128xf32, #tpu.memory_space<vmem>>, %arg4: memref<1x8x128xf32, #tpu.memory_space<vmem>>) attributes {dimension_semantics = [#tpu.dimension_semantics<parallel>, #tpu.dimension_semantics<arbitrary>], iteration_bounds = array<i64: 1, 1>, scalar_prefetch = 0 : i64, scratch_operands = 0 : i64, tpu.core_type = #tpu.core_type<tc>, window_params = [{transform_indices = @transform_0, window_bounds = array<i64: 1, 16, 128>}, {transform_indices = @transform_1, window_bounds = array<i64: 1, 16, 128>}, {transform_indices = @transform_2, window_bounds = array<i64: 1, 8, 128>}]} {
    %c0_i32 = arith.constant 0 : i32
    %0 = arith.cmpi eq, %arg1, %c0_i32 : i32
    %1 = arith.extui %0 : i1 to i32
    %c0_i32_0 = arith.constant 0 : i32
    %2 = arith.cmpi ne, %1, %c0_i32_0 : i32
    scf.if %2 {
      %cst_12 = arith.constant 0.000000e+00 : f32
      %23 = vector.broadcast %cst_12 : f32 to vector<8x128xf32>
      %c0_13 = arith.constant 0 : index
      %c0_14 = arith.constant 0 : index
      %c0_15 = arith.constant 0 : index
      %24 = vector.load %arg4[%c0_13, %c0_14, %c0_15] : memref<1x8x128xf32, #tpu.memory_space<vmem>>, vector<1x8x128xf32>
      %25 = vector.shape_cast %24 : vector<1x8x128xf32> to vector<8x128xf32>
      %26 = vector.shape_cast %23 : vector<8x128xf32> to vector<1x8x128xf32>
      tpu.vector_store %arg4[%c0_13, %c0_14, %c0_15], %26 {strides = array<i32>} : memref<1x8x128xf32, #tpu.memory_space<vmem>>, vector<1x8x128xf32>,
    } else {
    }
    %c0 = arith.constant 0 : index
    %c0_1 = arith.constant 0 : index
    %c0_2 = arith.constant 0 : index
    %3 = vector.load %arg4[%c0, %c0_1, %c0_2] : memref<1x8x128xf32, #tpu.memory_space<vmem>>, vector<1x8x128xf32>
    %4 = vector.shape_cast %3 : vector<1x8x128xf32> to vector<8x128xf32>
    %cst = arith.constant 0.000000e+00 : f32
    %5 = vector.broadcast %cst : f32 to vector<8x128xf32>
    %c0_i32_3 = arith.constant 0 : i32
    %c16_i32 = arith.constant 16 : i32
    %6 = arith.muli %c0_i32_3, %c16_i32 : i32
    %7 = tpu.assume_multiple %6, 16 : i32
    %c0_4 = arith.constant 0 : index
    %8 = arith.index_cast %7 : i32 to index
    %c0_5 = arith.constant 0 : index
    %9 = vector.load %arg2[%c0_4, %8, %c0_5] : memref<1x16x128xf32, #tpu.memory_space<vmem>>, vector<1x16x128xf32>
    %10 = vector.shape_cast %9 : vector<1x16x128xf32> to vector<16x128xf32>
    %c0_6 = arith.constant 0 : index
    %11 = arith.index_cast %7 : i32 to index
    %c0_7 = arith.constant 0 : index
    %12 = vector.load %arg3[%c0_6, %11, %c0_7] : memref<1x16x128xf32, #tpu.memory_space<vmem>>, vector<1x16x128xf32>
    %13 = vector.shape_cast %12 : vector<1x16x128xf32> to vector<16x128xf32>
    %14 = arith.subf %10, %13 : vector<16x128xf32>
    %15 = arith.mulf %14, %14 : vector<16x128xf32>
    %16 = vector.shape_cast %15 : vector<16x128xf32> to vector<2x8x128xf32>
    %cst_8 = arith.constant dense<0.000000e+00> : vector<8x128xf32>
    %17 = vector.multi_reduction <add>, %16, %cst_8 [0] : vector<2x8x128xf32> to vector<8x128xf32>
    %18 = arith.addf %5, %17 : vector<8x128xf32>
    %19 = arith.addf %4, %18 : vector<8x128xf32>
    %c0_9 = arith.constant 0 : index
    %c0_10 = arith.constant 0 : index
    %c0_11 = arith.constant 0 : index
    %20 = vector.load %arg4[%c0_9, %c0_10, %c0_11] : memref<1x8x128xf32, #tpu.memory_space<vmem>>, vector<1x8x128xf32>
    %21 = vector.shape_cast %20 : vector<1x8x128xf32> to vector<8x128xf32>
    %22 = vector.shape_cast %19 : vector<8x128xf32> to vector<1x8x128xf32>
    tpu.vector_store %arg4[%c0_9, %c0_10, %c0_11], %22 {strides = array<i32>} : memref<1x8x128xf32, #tpu.memory_space<vmem>>, vector<1x8x128xf32>,
    return
  }
  func.func @transform_0(%arg0: i32, %arg1: i32) -> (i32, i32, i32) {
    %c0_i32 = arith.constant 0 : i32
    %c0_i32_0 = arith.constant 0 : i32
    return %arg0, %arg1, %c0_i32 : i32, i32, i32
  }
  func.func @transform_1(%arg0: i32, %arg1: i32) -> (i32, i32, i32) {
    %c0_i32 = arith.constant 0 : i32
    %c0_i32_0 = arith.constant 0 : i32
    return %arg0, %arg1, %c0_i32 : i32, i32, i32
  }
  func.func @transform_2(%arg0: i32, %arg1: i32) -> (i32, i32, i32) {
    %c0_i32 = arith.constant 0 : i32
    %c0_i32_0 = arith.constant 0 : i32
    %c0_i32_1 = arith.constant 0 : i32
    return %arg0, %c0_i32, %c0_i32_0 : i32, i32, i32
  }
}

</mosaic_0001>

<bundles_post_ra>
// kernel: tpu_custom_call.1
= control target key start
LH: loop header
LB: loop body
LE: loop exit
PB: predicated region body
PF: predicated region fallthrough
CT: control target
= control target key end

     0   :  { %7 = vsyncpa [#allocation3], 0  ;;  %s193_s0 = inlined_call_operand.hbm [shape: f32[1,16,128], index: 0, kind: input, shape index: {}]   ;;  %s194_s1 = inlined_call_operand.hbm [shape: f32[1,16,128], index: 1, kind: input, shape index: {}]   ;;  %s195_s2 = inlined_call_operand.hbm [shape: f32[1,8,128], index: 2, kind: output, shape index: {}]  }
   0x1   :  { %8 = vsyncpa [#allocation6], 0 }
   0x2   :  { %9 = vsyncpa [#allocation4], 0  ;;  %s14_s11 = sshll.u32 %s193_s0, 4  ;;  %s164_s12 = smov [#allocation2]   ;;  %s15_s11 = int_to_ptr.hbm [resolvable:$true] %s14_s11 }
   0x3   :  { %s16_s13 = sshll.u32 %s164_s12, 4  ;;  %s27_s16 = sshll.u32 %s194_s1, 4  ;;  %s17_s13 = int_to_ptr.vmem [resolvable:$true] %s16_s13  ;;  %s28_s16 = int_to_ptr.hbm [resolvable:$true] %s27_s16 }
   0x4   :  { %s165_s17 = smov 128   ;;  %s166_s18 = smov 8  }
   0x5   :  { %22 = dma.hbm_to_vmem [thread:$0]  %s15_s11, 256, %s17_s13, [#allocation3], %s165_s17, %s165_s17, %s166_s18  }
   0x6   :  { %s167_s19 = smov [#allocation5]  }
   0x7   :  { %s29_s20 = sshll.u32 %s167_s19, 4  ;;  %s30_s20 = int_to_ptr.vmem [resolvable:$true] %s29_s20 }
   0x8   :  { %35 = dma.hbm_to_vmem [thread:$0]  %s28_s16, 256, %s30_s20, [#allocation6], %s165_s17, %s165_s17, %s166_s18  }
   0x9   :  { %158 = dma.done.wait [#allocation3], 256  }
   0xa   :  { %159 = vsyncadd [#allocation3], 4294967040 }
   0xb   :  { %160 = dma.done.wait [#allocation6], 256  }
   0xc   :  { %161 = vsyncadd [#allocation6], 4294967040  ;;  %v50_v0 = vld [vmem:[#allocation2] sm:$0xff]  ;;  %v51_v1 = vld [vmem:[#allocation2 + $0x8] sm:$0xff]  ;;  %s168_s0 = smov [#allocation7]   ;;  %s69_s23 = sshll.u32 %s195_s2, 4  ;;  %s70_s23 = int_to_ptr.hbm [resolvable:$true] %s69_s23 }
   0xd   :  { %v52_v2 = vld [vmem:[#allocation5] sm:$0xff]  ;;  %v53_v3 = vld [vmem:[#allocation5 + $0x8] sm:$0xff]  ;;  %s67_s1 = sshll.u32 %s168_s0, 4  ;;  %s68_s1 = int_to_ptr.vmem [resolvable:$true] %s67_s1 }
   0xe   :  { %v54_v4 = vsub.f32 %v50_v0, %v52_v2  ;;  %v55_v5 = vsub.f32 %v51_v1, %v53_v3 }
  0x10   :  { %v56_v6 = vmul.f32 %v54_v4, %v54_v4  ;;  %v57_v7 = vmul.f32 %v55_v5, %v55_v5 }
  0x12   :  { %v58_v8 = vadd.f32 %v57_v7, %v56_v6 }
  0x14   :  { %61 = vst [vmem:[#allocation7] sm:$0xff] %v58_v8 }
  0x15   :  { %72 = dma.vmem_to_hbm [thread:$0]  %s68_s1, 128, %s70_s23, [#allocation4]  }
  0x16   :  { %162 = dma.done.wait [#allocation4], 128  }
  0x17   :  { %163 = vsyncadd [#allocation4], 4294967168 }
  0x18   :  { %77 = vsyncpa [#allocation3], 1 }
  0x19   :  { %78 = vsyncpa [#allocation6], 1 }
  0x1a   :  { %79 = vsyncpa [#allocation4], 1 }

</bundles_post_ra>
